<compile_context>
chip_gen: v7x
topology: tpu7x:2x2x1
jax: 0.10.0
libtpu: 0.0.40
codegen_flags: <defaults>
</compile_context>

<pallas_src>
import jax
import jax.numpy as jnp
from jax.experimental import pallas as pl
from jax.experimental.pallas import tpu as pltpu


_ACTS = {
    'tanh': jnp.tanh,
    'relu': jax.nn.relu,
    'identity': lambda x: x,
}


def _round_up(x, m):
    return ((x + m - 1) // m) * m


def _block_diag(w, n):
    """Block-diagonal repeat of a (d, e) matrix n times -> (n*d, n*e)."""
    d, e = w.shape
    out = jnp.zeros((n * d, n * e), w.dtype)
    for m in range(n):
        out = out.at[m * d:(m + 1) * d, m * e:(m + 1) * e].set(w)
    return out


def _pick_tile(n):
    """Batch-tile rows: full block for tiny batches; ~n/2 rounded to 16 sublanes
    for mid batches (>=2 grid steps -> v7x megacore); 1024 rows for large ones."""
    if n <= 16:
        return n                                   # one block == full array (always legal)
    if n <= 2048:
        return min(_round_up((n + 1) // 2, 16), n)
    return 1024


# -----------------------------------------------------------------------------
# Fused kernel for one batch tile of TN rows.  Ref order:
#   dense (TN, Ds+nm*d+Dt) bf16, alerts (TN, A*ns) int32,
#   w_se (Dd, SEp) bf16, b_se (1, SEp) f32,
#   w1_dense (Dd, H1p) bf16, w1_ms (SEp, H1p) bf16, w1_alert (ns*ne, H1p) bf16,
#   b1 (1, H1p) f32, [W_l bf16, b_l f32] * n_mid, w_last_row (1, Hlp) f32,
#   b_last (1,1) f32, out (TN, 1) f32
# -----------------------------------------------------------------------------
def _make_critic_kernel(n_sources, n_slots, n_emb, n_mid, act):
    def kernel(dense_ref, alerts_ref,
               w_se_ref, b_se_ref,
               w1d_ref, w1ms_ref, w1a_ref, b1_ref,
               *rest):
        out_ref = rest[-1]
        b_last_ref = rest[-2]
        w_last_ref = rest[-3]
        mid_refs = rest[:-3]
        f32, bf16 = jnp.float32, jnp.bfloat16

        dense = dense_ref[...]                                # (TN, Dd) bf16
        tn = dense.shape[0]

        # (1) Missile-state embedding folded over the merged dense input
        #     (w_se has zero rows for the obs columns; padded cols stay tanh(0)=0).
        ms_emb = jnp.tanh(
            jnp.dot(dense, w_se_ref[...], preferred_element_type=f32)
            + b_se_ref[...])                                   # (TN, SEp) f32

        # (2) First MLP layer: obs part + missile-embedding part (2 MXU pushes).
        h = jnp.dot(dense, w1d_ref[...], preferred_element_type=f32)
        h = h + jnp.dot(ms_emb.astype(bf16), w1ms_ref[...],
                        preferred_element_type=f32)            # (TN, H1p) f32

        # (3) Alert path: one-hot counts over (slot, embedding-id) lanes (VPU)
        #     -> ONE matmul against the pre-fused (etab @ W1_alert) table.
        alerts = alerts_ref[...]                               # (TN, A*ns) int32
        n_cols = n_slots * n_emb
        lane = jax.lax.broadcasted_iota(jnp.int32, (tn, n_cols), 1)
        counts = jnp.zeros((tn, n_cols), f32)
        for k in range(n_sources):
            for s in range(n_slots):
                idx = alerts[:, k * n_slots + s:k * n_slots + s + 1] + s * n_emb
                counts = counts + (lane == idx).astype(f32)
        h = h + jnp.dot(counts.astype(bf16), w1a_ref[...],
                        preferred_element_type=f32)
        h = act(h + b1_ref[...])

        # (4) Middle hidden layers; weights lane-dense (128-padded), resident in VMEM.
        for l in range(n_mid):
            w = mid_refs[2 * l]
            b = mid_refs[2 * l + 1]
            h = act(jnp.dot(h.astype(bf16), w[...],
                            preferred_element_type=f32) + b[...])

        # (5) Final (H, 1) layer: VPU multiply + lane reduce (no degenerate MXU push).
        v = jnp.sum(h * w_last_ref[...], axis=-1, keepdims=True) + b_last_ref[...]
        out_ref[...] = v.astype(out_ref.dtype)

    return kernel


def mlp_critic_pallas(kp, obs_self, obs_tgt, ms, alerts, *, activation):
    """obs_self (N,Ds), obs_tgt (N,Dt), ms (N,nm*d), alerts (N,A,ns) int -> v (N,)."""
    n = obs_self.shape[0]
    n_sources, n_slots = alerts.shape[1], alerts.shape[2]
    n_emb = kp['n_emb']
    act = _ACTS[activation]

    # Single merged dense input stream (one fused concat+cast; bf16 halves DMA bytes).
    dense = jnp.concatenate([obs_self, ms, obs_tgt], axis=-1).astype(jnp.bfloat16)
    # Alerts keep their natural source-major column order: column = k*n_slots + s.
    alerts2 = alerts.reshape(n, n_sources * n_slots).astype(jnp.int32)

    # No batched padding: partial last blocks are handled by the grid; their extra
    # rows compute garbage that is discarded by out[:n].  Only a <8-row call
    # (interaction mode) is bumped to 8 rows to keep the matmul tiles well-formed.
    n_pad = n
    if n < 8:
        n_pad = 8
        dense = jnp.pad(dense, ((0, n_pad - n), (0, 0)))
        alerts2 = jnp.pad(alerts2, ((0, n_pad - n), (0, 0)))

    tn = _pick_tile(n_pad)
    grid = (pl.cdiv(n_pad, tn),)

    weights = [kp['w_se'], kp['b_se'], kp['w1_dense'], kp['w1_ms'],
               kp['w1_alert'], kp['b1']]
    for w, b in kp['mid']:
        weights += [w, b]
    weights += [kp['w_last_row'], kp['b_last']]

    in_specs = [
        pl.BlockSpec((tn, dense.shape[1]), lambda i: (i, 0)),
        pl.BlockSpec((tn, alerts2.shape[1]), lambda i: (i, 0)),
    ]
    for w in weights:     # weights: full-extent blocks, resident across grid steps
        in_specs.append(pl.BlockSpec(w.shape, lambda i: (0, 0)))

    kernel = _make_critic_kernel(n_sources, n_slots, n_emb, len(kp['mid']), act)

    out = pl.pallas_call(
        kernel,
        out_shape=jax.ShapeDtypeStruct((n_pad, 1), jnp.float32),
        grid_spec=pltpu.PrefetchScalarGridSpec(
            num_scalar_prefetch=0,
            grid=grid,
            in_specs=in_specs,
            out_specs=pl.BlockSpec((tn, 1), lambda i: (i, 0)),
        ),
        compiler_params=pltpu.CompilerParams(
            dimension_semantics=("parallel",),        # batch tiles -> v7x megacore
            vmem_limit_bytes=32 * 1024 * 1024),
    )(dense, alerts2, *weights)
    return out[:n, 0]


# -----------------------------------------------------------------------------
# MLPCritic module (JAX) mirroring the torch forward branching.
# -----------------------------------------------------------------------------
class MLPCritic:
    NUM_MISSILES = 4       # mis_state flatten -> 4 * state_embed_size
    NUM_ALERT_SLOTS = 2    # mis_alert flatten -> 2 * alert_embed_size

    def __init__(self, feature_layer, alert_num_embedding, obs_dim_self, obs_dim_target,
                 state_embed_size, alert_embed_size, hidden_sizes, activation='tanh',
                 missile_state_dim=8, key=None):
        # TODO(synk): AlertEmbeddingSimple / MissileStateEmbedding definitions are not in
        # the spec; assumed an nn.Embedding table and a shared per-missile Linear+tanh.
        self.feature_layer = feature_layer
        self.obs_dim_self = obs_dim_self
        self.obs_dim_target = obs_dim_target
        self.state_embed_size = state_embed_size
        self.alert_embed_size = alert_embed_size
        self.hidden_sizes = tuple(hidden_sizes)
        self.activation = activation          # torch passes an nn.Module class; str here
        self.missile_state_dim = missile_state_dim
        assert len(self.hidden_sizes) >= 1, "fused kernel expects >= 1 hidden layer"

        key = jax.random.PRNGKey(0) if key is None else key

        def linear(k, fan_in, fan_out):
            k1, k2 = jax.random.split(k)
            bound = 1.0 / (fan_in ** 0.5)
            w = jax.random.uniform(k1, (fan_in, fan_out), jnp.float32, -bound, bound)
            b = jax.random.uniform(k2, (fan_out,), jnp.float32, -bound, bound)
            return w, b

        key, k_se, k_et = jax.random.split(key, 3)
        w_se, b_se = linear(k_se, missile_state_dim, state_embed_size)
        etab = jax.random.normal(k_et, (alert_num_embedding, alert_embed_size), jnp.float32)

        nm, ns = self.NUM_MISSILES, self.NUM_ALERT_SLOTS
        d_in = (obs_dim_self + obs_dim_target
                + ns * alert_embed_size + nm * state_embed_size)
        sizes = [d_in] + list(self.hidden_sizes) + [1]
        mlp_layers = []
        for j in range(len(sizes) - 1):
            key, kl = jax.random.split(key)
            mlp_layers.append(linear(kl, sizes[j], sizes[j + 1]))

        self.ref_params = {'w_se': w_se, 'b_se': b_se, 'etab': etab, 'mlp': mlp_layers}

        # ---- Kernel-arranged parameters (static precomputation; same math) ----
        Ds, Dt = obs_dim_self, obs_dim_target
        Es, Ea, md = state_embed_size, alert_embed_size, missile_state_dim
        Dd = Ds + nm * md + Dt                  # merged dense input width
        SE = nm * Es
        SEp = _round_up(SE, 128)                # lane-dense embedding width
        Hs = list(self.hidden_sizes)
        Hp = [_round_up(h, 128) for h in Hs]    # lane-dense hidden widths
        f32, bf16 = jnp.float32, jnp.bfloat16
        ne = alert_num_embedding

        w1, b1 = mlp_layers[0]
        r = 0
        w1_self = w1[r:r + Ds]; r += Ds
        w1_ms = w1[r:r + SE]; r += SE
        w1_tgt = w1[r:r + Dt]; r += Dt
        w1_al = w1[r:r + ns * Ea].reshape(ns, Ea, Hs[0])

        # (a) missile-state embedding folded over the merged [obs_self|ms|obs_tgt] input
        w_se_pad = jnp.zeros((Dd, SEp), f32)
        w_se_pad = w_se_pad.at[Ds:Ds + nm * md, :SE].set(_block_diag(w_se, nm))
        b_se_pad = jnp.zeros((1, SEp), f32).at[0, :SE].set(jnp.tile(b_se, nm))

        # (b) W1 over the merged dense input (obs rows only; raw-missile rows zero)
        w1_dense = jnp.zeros((Dd, Hp[0]), f32)
        w1_dense = w1_dense.at[:Ds, :Hs[0]].set(w1_self)
        w1_dense = w1_dense.at[Ds + nm * md:, :Hs[0]].set(w1_tgt)

        # (c) W1 missile-embedding block, lane-dense padded
        w1_ms_pad = jnp.zeros((SEp, Hp[0]), f32).at[:SE, :Hs[0]].set(w1_ms)

        # (d) fused alert path: row (slot s, embedding id e) = etab[e] @ W1_alert[s]
        w1_alert = jnp.zeros((ns * ne, Hp[0]), f32)
        for s in range(ns):
            w1_alert = w1_alert.at[s * ne:(s + 1) * ne, :Hs[0]].set(etab @ w1_al[s])

        b1_pad = jnp.zeros((1, Hp[0]), f32).at[0, :Hs[0]].set(b1)

        # middle hidden layers, zero-padded to lane-dense widths (exact: extra rows/cols 0)
        mids = []
        for li in range(1, len(Hs)):
            w, b = mlp_layers[li]
            wp = jnp.zeros((Hp[li - 1], Hp[li]), f32).at[:Hs[li - 1], :Hs[li]].set(w)
            bp = jnp.zeros((1, Hp[li]), f32).at[0, :Hs[li]].set(b)
            mids.append((wp.astype(bf16), bp))

        # final (H_last, 1) layer kept as a lane row for the in-kernel VPU reduce
        w_last, b_last = mlp_layers[-1]
        w_last_row = jnp.zeros((1, Hp[-1]), f32).at[0, :Hs[-1]].set(w_last[:, 0])

        self.kparams = {
            'w_se': w_se_pad.astype(bf16), 'b_se': b_se_pad,
            'w1_dense': w1_dense.astype(bf16), 'w1_ms': w1_ms_pad.astype(bf16),
            'w1_alert': w1_alert.astype(bf16), 'b1': b1_pad,
            'mid': mids,
            'w_last_row': w_last_row, 'b_last': b_last.reshape(1, 1),
            'n_emb': ne,
        }

    # core call into the fused Pallas kernel
    def _run(self, obs_self2, obs_tgt2, ms2, alerts3):
        return mlp_critic_pallas(
            self.kparams,
            jnp.asarray(obs_self2, jnp.float32),
            jnp.asarray(obs_tgt2, jnp.float32),
            jnp.asarray(ms2, jnp.float32),
            jnp.asarray(alerts3, jnp.int32),
            activation=self.activation)

    def forward(self, obs_self, obs_target, missile_states, missile_alerts, seq_len):
        a_shape = missile_alerts.shape
        if self.feature_layer is None:
            if missile_alerts.ndim < 3:   # single un-batched sample
                v = self._run(jnp.reshape(obs_self, (1, -1)),
                              jnp.reshape(obs_target, (1, -1)),
                              jnp.reshape(missile_states, (1, -1)),
                              jnp.reshape(missile_alerts, (1,) + a_shape[-2:]))
                return v[0]
            n = a_shape[0]
            return self._run(jnp.reshape(obs_self, (n, -1)),
                             jnp.reshape(obs_target, (n, -1)),
                             jnp.reshape(missile_states, (n, -1)),
                             jnp.reshape(missile_alerts, (n,) + a_shape[-2:]))
        elif self.feature_layer in ('lstm', 'gru'):
            # NOTE: as in the torch module, the critic value itself does not consume the
            # RNN features; feature_layer only changes how the batch is reshaped.
            if seq_len == 1 and obs_target.ndim < 3:   # interaction mode
                v = self._run(jnp.reshape(obs_self, (1, -1)),
                              jnp.reshape(obs_target, (1, -1)),
                              jnp.reshape(missile_states, (1, -1)),
                              jnp.reshape(missile_alerts, (1,) + a_shape[-2:]))
                return v[0]
            b, t = obs_self.shape[0], obs_self.shape[1]
            return self._run(jnp.reshape(obs_self, (b * t, -1)),
                             jnp.reshape(obs_target, (b * t, -1)),
                             jnp.reshape(missile_states, (b * t, -1)),
                             jnp.reshape(missile_alerts, (b * t,) + a_shape[-2:]))
        raise ValueError(f'unknown feature_layer {self.feature_layer!r}')

    __call__ = forward


# -----------------------------------------------------------------------------
# Pure-JAX f32 reference (straight port of the torch ops) for correctness checking.
# -----------------------------------------------------------------------------
def _critic_ref(model, obs_self2, obs_tgt2, ms2, alerts3):
    p = model.ref_params
    act = _ACTS[model.activation]
    n = ms2.shape[0]
    nm, ns = model.NUM_MISSILES, model.NUM_ALERT_SLOTS
    ms_r = ms2.reshape(n, nm, model.missile_state_dim)
    emb = jnp.tanh(ms_r @ p['w_se'] + p['b_se'])                  # (N, nm, Es)
    ms_flat = emb.reshape(n, nm * model.state_embed_size)
    a_emb = p['etab'][alerts3]                                    # (N, A, ns, Ea)
    a_flat = a_emb.sum(axis=-3).reshape(n, ns * model.alert_embed_size)
    x = jnp.concatenate([obs_self2, ms_flat, obs_tgt2, a_flat], axis=-1)
    h = x
    layers = p['mlp']
    for i, (w, b) in enumerate(layers):
        h = h @ w + b
        if i < len(layers) - 1:
            h = act(h)
    return h[:, 0]


if __name__ == "__main__":
    obs_dim_self, obs_dim_target = 16, 16
    state_embed_size, alert_embed_size = 8, 8
    alert_num_embedding = 8
    hidden_sizes = (64, 64)
    missile_state_dim = 8                  # per-missile feature dim (4 missiles -> 32)
    num_missiles, num_alert_slots = 4, 2
    num_alert_sources = 4
    seq_num, seq_len = 2, 8                # LSTM-feature seq branch: 16 rows total

    model = MLPCritic('lstm', alert_num_embedding, obs_dim_self, obs_dim_target,
                      state_embed_size, alert_embed_size, hidden_sizes,
                      activation='tanh', missile_state_dim=missile_state_dim,
                      key=jax.random.PRNGKey(0))

    key = jax.random.PRNGKey(0)
    k1, k2, k3, k4 = jax.random.split(key, 4)
    obs_self = jax.random.normal(k1, (seq_num, seq_len, obs_dim_self), jnp.float32)
    obs_target = jax.random.normal(k2, (seq_num, seq_len, obs_dim_target), jnp.float32)
    missile_states = jax.random.normal(
        k3, (seq_num, seq_len, num_missiles * missile_state_dim), jnp.float32)
    missile_alerts = jax.random.randint(
        k4, (seq_num, seq_len, num_alert_sources, num_alert_slots),
        0, alert_num_embedding)

    # bf16 matmul operands (f32 accumulation) -> tolerance vs the f32 reference is
    # relaxed; expected deviation is O(1e-3) for these value magnitudes.
    TOL = dict(atol=2e-2, rtol=2e-2)

    # 1) feature_layer='lstm' sequence branch (B*T rows through one fused kernel call)
    v = model.forward(obs_self, obs_target, missile_states, missile_alerts, seq_len)
    v = jax.block_until_ready(v)
    assert v.shape == (seq_num * seq_len,)

    os2 = obs_self.reshape(seq_num * seq_len, -1)
    ot2 = obs_target.reshape(seq_num * seq_len, -1)
    ms2 = missile_states.reshape(seq_num * seq_len, -1)
    al3 = missile_alerts.reshape(seq_num * seq_len, num_alert_sources, num_alert_slots)
    v_ref = _critic_ref(model, os2, ot2, ms2, al3)
    assert jnp.allclose(v, v_ref, **TOL), f"max diff {jnp.max(jnp.abs(v - v_ref))}"

    # 2) interaction mode (seq_len == 1, un-batched inputs)
    v1 = model.forward(obs_self[0, 0], obs_target[0, 0], missile_states[0, 0],
                       missile_alerts[0, 0], seq_len=1)
    v1 = jax.block_until_ready(v1)
    assert v1.shape == ()
    assert jnp.allclose(v1, v_ref[0], **TOL)

    # 3) feature_layer=None batched branch (same fused kernel, different reshape path)
    model_none = MLPCritic(None, alert_num_embedding, obs_dim_self, obs_dim_target,
                           state_embed_size, alert_embed_size, hidden_sizes,
                           activation='tanh', missile_state_dim=missile_state_dim,
                           key=jax.random.PRNGKey(1))
    v2 = model_none.forward(os2, ot2, ms2, al3, seq_len=1)
    v2 = jax.block_until_ready(v2)
    v2_ref = _critic_ref(model_none, os2, ot2, ms2, al3)
    assert v2.shape == (seq_num * seq_len,)
    assert jnp.allclose(v2, v2_ref, **TOL), f"max diff {jnp.max(jnp.abs(v2 - v2_ref))}"

    print("KERNEL_OK")
</pallas_src>

<mosaic_0001>
module attributes {stable_mosaic.version = 11 : i64} {
  func.func @kernel(%arg0: i32, %arg1: memref<16x64xbf16, #tpu.memory_space<vmem>>, %arg2: memref<16x8xi32, #tpu.memory_space<vmem>>, %arg3: memref<64x128xbf16, #tpu.memory_space<vmem>>, %arg4: memref<1x128xf32, #tpu.memory_space<vmem>>, %arg5: memref<64x128xbf16, #tpu.memory_space<vmem>>, %arg6: memref<128x128xbf16, #tpu.memory_space<vmem>>, %arg7: memref<16x128xbf16, #tpu.memory_space<vmem>>, %arg8: memref<1x128xf32, #tpu.memory_space<vmem>>, %arg9: memref<128x128xbf16, #tpu.memory_space<vmem>>, %arg10: memref<1x128xf32, #tpu.memory_space<vmem>>, %arg11: memref<1x128xf32, #tpu.memory_space<vmem>>, %arg12: memref<1x1xf32, #tpu.memory_space<vmem>>, %arg13: memref<16x1xf32, #tpu.memory_space<vmem>>) attributes {dimension_semantics = [#tpu.dimension_semantics<parallel>], iteration_bounds = array<i64: 1>, scalar_prefetch = 0 : i64, scratch_operands = 0 : i64, tpu.core_type = #tpu.core_type<tc>, window_params = [{transform_indices = @transform_0, window_bounds = array<i64: 16, 64>}, {transform_indices = @transform_1, window_bounds = array<i64: 16, 8>}, {pipeline_mode = #tpu.pipeline_mode<synchronous>, transform_indices = @transform_2, window_bounds = array<i64: 64, 128>}, {pipeline_mode = #tpu.pipeline_mode<synchronous>, transform_indices = @transform_3, window_bounds = array<i64: 1, 128>}, {pipeline_mode = #tpu.pipeline_mode<synchronous>, transform_indices = @transform_4, window_bounds = array<i64: 64, 128>}, {pipeline_mode = #tpu.pipeline_mode<synchronous>, transform_indices = @transform_5, window_bounds = array<i64: 128, 128>}, {pipeline_mode = #tpu.pipeline_mode<synchronous>, transform_indices = @transform_6, window_bounds = array<i64: 16, 128>}, {pipeline_mode = #tpu.pipeline_mode<synchronous>, transform_indices = @transform_7, window_bounds = array<i64: 1, 128>}, {pipeline_mode = #tpu.pipeline_mode<synchronous>, transform_indices = @transform_8, window_bounds = array<i64: 128, 128>}, {pipeline_mode = #tpu.pipeline_mode<synchronous>, transform_indices = @transform_9, window_bounds = array<i64: 1, 128>}, {pipeline_mode = #tpu.pipeline_mode<synchronous>, transform_indices = @transform_10, window_bounds = array<i64: 1, 128>}, {pipeline_mode = #tpu.pipeline_mode<synchronous>, transform_indices = @transform_11, window_bounds = array<i64: 1, 1>}, {transform_indices = @transform_12, window_bounds = array<i64: 16, 1>}]} {
    %c0 = arith.constant 0 : index
    %c0_0 = arith.constant 0 : index
    %0 = vector.load %arg1[%c0, %c0_0] : memref<16x64xbf16, #tpu.memory_space<vmem>>, vector<16x64xbf16>
    %c0_1 = arith.constant 0 : index
    %c0_2 = arith.constant 0 : index
    %1 = vector.load %arg3[%c0_1, %c0_2] : memref<64x128xbf16, #tpu.memory_space<vmem>>, vector<64x128xbf16>
    %cst = arith.constant dense<0.000000e+00> : vector<16x128xf32>
    %2 = tpu.matmul %0, %1, %cst {dimension_numbers = #tpu.dot_dimension_numbers<[1], [0], [0], [1], [0, 0, 1, 1], [], []>} : vector<16x64xbf16>, vector<64x128xbf16>, vector<16x128xf32> -> vector<16x128xf32>
    %c0_3 = arith.constant 0 : index
    %c0_4 = arith.constant 0 : index
    %3 = vector.load %arg4[%c0_3, %c0_4] : memref<1x128xf32, #tpu.memory_space<vmem>>, vector<1x128xf32>
    %4 = vector.broadcast %3 : vector<1x128xf32> to vector<16x128xf32>
    %5 = arith.addf %2, %4 : vector<16x128xf32>
    %6 = math.tanh %5 : vector<16x128xf32>
    %c0_5 = arith.constant 0 : index
    %c0_6 = arith.constant 0 : index
    %7 = vector.load %arg5[%c0_5, %c0_6] : memref<64x128xbf16, #tpu.memory_space<vmem>>, vector<64x128xbf16>
    %cst_7 = arith.constant dense<0.000000e+00> : vector<16x128xf32>
    %8 = tpu.matmul %0, %7, %cst_7 {dimension_numbers = #tpu.dot_dimension_numbers<[1], [0], [0], [1], [0, 0, 1, 1], [], []>} : vector<16x64xbf16>, vector<64x128xbf16>, vector<16x128xf32> -> vector<16x128xf32>
    %9 = arith.truncf %6 : vector<16x128xf32> to vector<16x128xbf16>
    %c0_8 = arith.constant 0 : index
    %c0_9 = arith.constant 0 : index
    %10 = vector.load %arg6[%c0_8, %c0_9] : memref<128x128xbf16, #tpu.memory_space<vmem>>, vector<128x128xbf16>
    %cst_10 = arith.constant dense<0.000000e+00> : vector<16x128xf32>
    %11 = tpu.matmul %9, %10, %cst_10 {dimension_numbers = #tpu.dot_dimension_numbers<[1], [0], [0], [1], [0, 0, 1, 1], [], []>} : vector<16x128xbf16>, vector<128x128xbf16>, vector<16x128xf32> -> vector<16x128xf32>
    %12 = arith.addf %8, %11 : vector<16x128xf32>
    %c0_11 = arith.constant 0 : index
    %c0_12 = arith.constant 0 : index
    %13 = vector.load %arg2[%c0_11, %c0_12] : memref<16x8xi32, #tpu.memory_space<vmem>>, vector<16x8xi32>
    %14 = tpu.iota {dimensions = array<i32: 1>} : vector<16x16xi32>
    %cst_13 = arith.constant 0.000000e+00 : f32
    %15 = vector.broadcast %cst_13 : f32 to vector<16x16xf32>
    %16 = vector.extract_strided_slice %13 {offsets = [0, 0], sizes = [16, 1], strides = [1, 1]} : vector<16x8xi32> to vector<16x1xi32>
    %c0_i32 = arith.constant 0 : i32
    %17 = vector.broadcast %c0_i32 : i32 to vector<16x1xi32>
    %18 = arith.addi %16, %17 : vector<16x1xi32>
    %19 = vector.broadcast %18 : vector<16x1xi32> to vector<16x16xi32>
    %20 = arith.cmpi eq, %14, %19 : vector<16x16xi32>
    %21 = arith.extui %20 : vector<16x16xi1> to vector<16x16xi32>
    %22 = arith.sitofp %21 : vector<16x16xi32> to vector<16x16xf32>
    %23 = arith.addf %15, %22 : vector<16x16xf32>
    %24 = vector.extract_strided_slice %13 {offsets = [0, 1], sizes = [16, 1], strides = [1, 1]} : vector<16x8xi32> to vector<16x1xi32>
    %c8_i32 = arith.constant 8 : i32
    %25 = vector.broadcast %c8_i32 : i32 to vector<16x1xi32>
    %26 = arith.addi %24, %25 : vector<16x1xi32>
    %27 = vector.broadcast %26 : vector<16x1xi32> to vector<16x16xi32>
    %28 = arith.cmpi eq, %14, %27 : vector<16x16xi32>
    %29 = arith.extui %28 : vector<16x16xi1> to vector<16x16xi32>
    %30 = arith.sitofp %29 : vector<16x16xi32> to vector<16x16xf32>
    %31 = arith.addf %23, %30 : vector<16x16xf32>
    %32 = vector.extract_strided_slice %13 {offsets = [0, 2], sizes = [16, 1], strides = [1, 1]} : vector<16x8xi32> to vector<16x1xi32>
    %c0_i32_14 = arith.constant 0 : i32
    %33 = vector.broadcast %c0_i32_14 : i32 to vector<16x1xi32>
    %34 = arith.addi %32, %33 : vector<16x1xi32>
    %35 = vector.broadcast %34 : vector<16x1xi32> to vector<16x16xi32>
    %36 = arith.cmpi eq, %14, %35 : vector<16x16xi32>
    %37 = arith.extui %36 : vector<16x16xi1> to vector<16x16xi32>
    %38 = arith.sitofp %37 : vector<16x16xi32> to vector<16x16xf32>
    %39 = arith.addf %31, %38 : vector<16x16xf32>
    %40 = vector.extract_strided_slice %13 {offsets = [0, 3], sizes = [16, 1], strides = [1, 1]} : vector<16x8xi32> to vector<16x1xi32>
    %c8_i32_15 = arith.constant 8 : i32
    %41 = vector.broadcast %c8_i32_15 : i32 to vector<16x1xi32>
    %42 = arith.addi %40, %41 : vector<16x1xi32>
    %43 = vector.broadcast %42 : vector<16x1xi32> to vector<16x16xi32>
    %44 = arith.cmpi eq, %14, %43 : vector<16x16xi32>
    %45 = arith.extui %44 : vector<16x16xi1> to vector<16x16xi32>
    %46 = arith.sitofp %45 : vector<16x16xi32> to vector<16x16xf32>
    %47 = arith.addf %39, %46 : vector<16x16xf32>
    %48 = vector.extract_strided_slice %13 {offsets = [0, 4], sizes = [16, 1], strides = [1, 1]} : vector<16x8xi32> to vector<16x1xi32>
    %c0_i32_16 = arith.constant 0 : i32
    %49 = vector.broadcast %c0_i32_16 : i32 to vector<16x1xi32>
    %50 = arith.addi %48, %49 : vector<16x1xi32>
    %51 = vector.broadcast %50 : vector<16x1xi32> to vector<16x16xi32>
    %52 = arith.cmpi eq, %14, %51 : vector<16x16xi32>
    %53 = arith.extui %52 : vector<16x16xi1> to vector<16x16xi32>
    %54 = arith.sitofp %53 : vector<16x16xi32> to vector<16x16xf32>
    %55 = arith.addf %47, %54 : vector<16x16xf32>
    %56 = vector.extract_strided_slice %13 {offsets = [0, 5], sizes = [16, 1], strides = [1, 1]} : vector<16x8xi32> to vector<16x1xi32>
    %c8_i32_17 = arith.constant 8 : i32
    %57 = vector.broadcast %c8_i32_17 : i32 to vector<16x1xi32>
    %58 = arith.addi %56, %57 : vector<16x1xi32>
    %59 = vector.broadcast %58 : vector<16x1xi32> to vector<16x16xi32>
    %60 = arith.cmpi eq, %14, %59 : vector<16x16xi32>
    %61 = arith.extui %60 : vector<16x16xi1> to vector<16x16xi32>
    %62 = arith.sitofp %61 : vector<16x16xi32> to vector<16x16xf32>
    %63 = arith.addf %55, %62 : vector<16x16xf32>
    %64 = vector.extract_strided_slice %13 {offsets = [0, 6], sizes = [16, 1], strides = [1, 1]} : vector<16x8xi32> to vector<16x1xi32>
    %c0_i32_18 = arith.constant 0 : i32
    %65 = vector.broadcast %c0_i32_18 : i32 to vector<16x1xi32>
    %66 = arith.addi %64, %65 : vector<16x1xi32>
    %67 = vector.broadcast %66 : vector<16x1xi32> to vector<16x16xi32>
    %68 = arith.cmpi eq, %14, %67 : vector<16x16xi32>
    %69 = arith.extui %68 : vector<16x16xi1> to vector<16x16xi32>
    %70 = arith.sitofp %69 : vector<16x16xi32> to vector<16x16xf32>
    %71 = arith.addf %63, %70 : vector<16x16xf32>
    %72 = vector.extract_strided_slice %13 {offsets = [0, 7], sizes = [16, 1], strides = [1, 1]} : vector<16x8xi32> to vector<16x1xi32>
    %c8_i32_19 = arith.constant 8 : i32
    %73 = vector.broadcast %c8_i32_19 : i32 to vector<16x1xi32>
    %74 = arith.addi %72, %73 : vector<16x1xi32>
    %75 = vector.broadcast %74 : vector<16x1xi32> to vector<16x16xi32>
    %76 = arith.cmpi eq, %14, %75 : vector<16x16xi32>
    %77 = arith.extui %76 : vector<16x16xi1> to vector<16x16xi32>
    %78 = arith.sitofp %77 : vector<16x16xi32> to vector<16x16xf32>
    %79 = arith.addf %71, %78 : vector<16x16xf32>
    %80 = arith.truncf %79 : vector<16x16xf32> to vector<16x16xbf16>
    %c0_20 = arith.constant 0 : index
    %c0_21 = arith.constant 0 : index
    %81 = vector.load %arg7[%c0_20, %c0_21] : memref<16x128xbf16, #tpu.memory_space<vmem>>, vector<16x128xbf16>
    %cst_22 = arith.constant dense<0.000000e+00> : vector<16x128xf32>
    %82 = tpu.matmul %80, %81, %cst_22 {dimension_numbers = #tpu.dot_dimension_numbers<[1], [0], [0], [1], [0, 0, 1, 1], [], []>} : vector<16x16xbf16>, vector<16x128xbf16>, vector<16x128xf32> -> vector<16x128xf32>
    %83 = arith.addf %12, %82 : vector<16x128xf32>
    %c0_23 = arith.constant 0 : index
    %c0_24 = arith.constant 0 : index
    %84 = vector.load %arg8[%c0_23, %c0_24] : memref<1x128xf32, #tpu.memory_space<vmem>>, vector<1x128xf32>
    %85 = vector.broadcast %84 : vector<1x128xf32> to vector<16x128xf32>
    %86 = arith.addf %83, %85 : vector<16x128xf32>
    %87 = math.tanh %86 : vector<16x128xf32>
    %88 = arith.truncf %87 : vector<16x128xf32> to vector<16x128xbf16>
    %c0_25 = arith.constant 0 : index
    %c0_26 = arith.constant 0 : index
    %89 = vector.load %arg9[%c0_25, %c0_26] : memref<128x128xbf16, #tpu.memory_space<vmem>>, vector<128x128xbf16>
    %cst_27 = arith.constant dense<0.000000e+00> : vector<16x128xf32>
    %90 = tpu.matmul %88, %89, %cst_27 {dimension_numbers = #tpu.dot_dimension_numbers<[1], [0], [0], [1], [0, 0, 1, 1], [], []>} : vector<16x128xbf16>, vector<128x128xbf16>, vector<16x128xf32> -> vector<16x128xf32>
    %c0_28 = arith.constant 0 : index
    %c0_29 = arith.constant 0 : index
    %91 = vector.load %arg10[%c0_28, %c0_29] : memref<1x128xf32, #tpu.memory_space<vmem>>, vector<1x128xf32>
    %92 = vector.broadcast %91 : vector<1x128xf32> to vector<16x128xf32>
    %93 = arith.addf %90, %92 : vector<16x128xf32>
    %94 = math.tanh %93 : vector<16x128xf32>
    %c0_30 = arith.constant 0 : index
    %c0_31 = arith.constant 0 : index
    %95 = vector.load %arg11[%c0_30, %c0_31] : memref<1x128xf32, #tpu.memory_space<vmem>>, vector<1x128xf32>
    %96 = vector.broadcast %95 : vector<1x128xf32> to vector<16x128xf32>
    %97 = arith.mulf %94, %96 : vector<16x128xf32>
    %cst_32 = arith.constant dense<0.000000e+00> : vector<16xf32>
    %98 = vector.multi_reduction <add>, %97, %cst_32 [1] : vector<16x128xf32> to vector<16xf32>
    %99 = vector.shape_cast %98 : vector<16xf32> to vector<16x1xf32>
    %c0_33 = arith.constant 0 : index
    %c0_34 = arith.constant 0 : index
    %100 = vector.load %arg12[%c0_33, %c0_34] : memref<1x1xf32, #tpu.memory_space<vmem>>, vector<1x1xf32>
    %101 = vector.broadcast %100 : vector<1x1xf32> to vector<16x1xf32>
    %102 = arith.addf %99, %101 : vector<16x1xf32>
    %c0_35 = arith.constant 0 : index
    %c0_36 = arith.constant 0 : index
    %103 = vector.load %arg13[%c0_35, %c0_36] : memref<16x1xf32, #tpu.memory_space<vmem>>, vector<16x1xf32>
    tpu.vector_store %arg13[%c0_35, %c0_36], %102 {strides = array<i32>} : memref<16x1xf32, #tpu.memory_space<vmem>>, vector<16x1xf32>,
    return
  }
  func.func @transform_0(%arg0: i32) -> (i32, i32) {
    %c0_i32 = arith.constant 0 : i32
    %c0_i32_0 = arith.constant 0 : i32
    return %arg0, %c0_i32 : i32, i32
  }
  func.func @transform_1(%arg0: i32) -> (i32, i32) {
    %c0_i32 = arith.constant 0 : i32
    %c0_i32_0 = arith.constant 0 : i32
    return %arg0, %c0_i32 : i32, i32
  }
  func.func @transform_2(%arg0: i32) -> (i32, i32) {
    %c0_i32 = arith.constant 0 : i32
    %c0_i32_0 = arith.constant 0 : i32
    %c0_i32_1 = arith.constant 0 : i32
    return %c0_i32, %c0_i32_0 : i32, i32
  }
  func.func @transform_3(%arg0: i32) -> (i32, i32) {
    %c0_i32 = arith.constant 0 : i32
    %c0_i32_0 = arith.constant 0 : i32
    %c0_i32_1 = arith.constant 0 : i32
    return %c0_i32, %c0_i32_0 : i32, i32
  }
  func.func @transform_4(%arg0: i32) -> (i32, i32) {
    %c0_i32 = arith.constant 0 : i32
    %c0_i32_0 = arith.constant 0 : i32
    %c0_i32_1 = arith.constant 0 : i32
    return %c0_i32, %c0_i32_0 : i32, i32
  }
  func.func @transform_5(%arg0: i32) -> (i32, i32) {
    %c0_i32 = arith.constant 0 : i32
    %c0_i32_0 = arith.constant 0 : i32
    %c0_i32_1 = arith.constant 0 : i32
    return %c0_i32, %c0_i32_0 : i32, i32
  }
  func.func @transform_6(%arg0: i32) -> (i32, i32) {
    %c0_i32 = arith.constant 0 : i32
    %c0_i32_0 = arith.constant 0 : i32
    %c0_i32_1 = arith.constant 0 : i32
    return %c0_i32, %c0_i32_0 : i32, i32
  }
  func.func @transform_7(%arg0: i32) -> (i32, i32) {
    %c0_i32 = arith.constant 0 : i32
    %c0_i32_0 = arith.constant 0 : i32
    %c0_i32_1 = arith.constant 0 : i32
    return %c0_i32, %c0_i32_0 : i32, i32
  }
  func.func @transform_8(%arg0: i32) -> (i32, i32) {
    %c0_i32 = arith.constant 0 : i32
    %c0_i32_0 = arith.constant 0 : i32
    %c0_i32_1 = arith.constant 0 : i32
    return %c0_i32, %c0_i32_0 : i32, i32
  }
  func.func @transform_9(%arg0: i32) -> (i32, i32) {
    %c0_i32 = arith.constant 0 : i32
    %c0_i32_0 = arith.constant 0 : i32
    %c0_i32_1 = arith.constant 0 : i32
    return %c0_i32, %c0_i32_0 : i32, i32
  }
  func.func @transform_10(%arg0: i32) -> (i32, i32) {
    %c0_i32 = arith.constant 0 : i32
    %c0_i32_0 = arith.constant 0 : i32
    %c0_i32_1 = arith.constant 0 : i32
    return %c0_i32, %c0_i32_0 : i32, i32
  }
  func.func @transform_11(%arg0: i32) -> (i32, i32) {
    %c0_i32 = arith.constant 0 : i32
    %c0_i32_0 = arith.constant 0 : i32
    %c0_i32_1 = arith.constant 0 : i32
    return %c0_i32, %c0_i32_0 : i32, i32
  }
  func.func @transform_12(%arg0: i32) -> (i32, i32) {
    %c0_i32 = arith.constant 0 : i32
    %c0_i32_0 = arith.constant 0 : i32
    return %arg0, %c0_i32 : i32, i32
  }
}

</mosaic_0001>

<bundles_post_ra>
// kernel: tpu_custom_call.1
= control target key start
LH: loop header
LB: loop body
LE: loop exit
PB: predicated region body
PF: predicated region fallthrough
CT: control target
= control target key end

     0   :  { %s1264_s0 = inlined_call_operand.hbm [shape: bf16[16,64], index: 0, kind: input, shape index: {}]   ;;  %s1265_s1 = inlined_call_operand.vmem [shape: s32[16,8], index: 1, kind: input, shape index: {}]   ;;  %s1266_s2 = inlined_call_operand.vmem [shape: bf16[64,128], index: 2, kind: input, shape index: {}]   ;;  %s1267_s3 = inlined_call_operand.vmem [shape: f32[1,128], index: 3, kind: input, shape index: {}]   ;;  %s1268_s4 = inlined_call_operand.hbm [shape: bf16[64,128], index: 4, kind: input, shape index: {}]   ;;  %s1269_s5 = inlined_call_operand.hbm [shape: bf16[128,128], index: 5, kind: input, shape index: {}]   ;;  %s1270_s6 = inlined_call_operand.vmem [shape: bf16[16,128], index: 6, kind: input, shape index: {}]   ;;  %s1271_s7 = inlined_call_operand.vmem [shape: f32[1,128], index: 7, kind: input, shape index: {}]   ;;  %s1272_s8 = inlined_call_operand.hbm [shape: bf16[128,128], index: 8, kind: input, shape index: {}]   ;;  %s1273_s9 = inlined_call_operand.vmem [shape: f32[1,128], index: 9, kind: input, shape index: {}]   ;;  %s1274_s10 = inlined_call_operand.vmem [shape: f32[1,128], index: 10, kind: input, shape index: {}]   ;;  %s1275_s11 = inlined_call_operand.<no memory space> [shape: f32[1,1], index: 11, kind: input, shape index: {}]   ;;  %s1276_s12 = inlined_call_operand.vmem [shape: f32[16,1], index: 12, kind: output, shape index: {}]  }
   0x1   :  { %v17_v0 = vstv %s1275_s11 }
   0x2   :  { %18 = vst [vmem:[#allocation2] sm:$0x1] %v17_v0 }
   0x3   :  { %19 = vsyncpa [#allocation4], 0 }
   0x4   :  { %20 = vsyncpa [#allocation6], 0 }
   0x5   :  { %21 = vsyncpa [#allocation9], 0  ;;  %s1014_s23 = smov [#allocation5]   ;;  %s1015_s25 = smov [#allocation3]  }
   0x6   :  { %s45_s24 = sshll.u32 %s1014_s23, 4  ;;  %s27_s26 = sshll.u32 %s1015_s25, 4  ;;  %s46_s24 = int_to_ptr.vmem [resolvable:$true] %s45_s24  ;;  %s1098_s26 = int_to_ptr.vmem [resolvable:$true] %s27_s26 }
   0x7   :  { %s920_s29 = scalar_lea.hbm %s1268_s4, 512 }
   0x8   :  { %p921_p0 = scmp.ne.s32.totalorder %s1268_s4, %s920_s29  ;;  %p924_p1 = scmp.lt.u32.totalorder %s920_s29, %s1268_s4 }
   0xa   :  { %p926_p2 = pnand %p924_p1, %p921_p0 }
   0xc   :  { %929 = shalt.err (!%p926_p2)
}
   0xd   :  { %s930_s15 = scalar_lea.vmem %s46_s24, 512  ;;  %p935_p4 = scmp.lt.s32.totalorder %s46_s24, %s46_s24 }
   0xe   :  { %p931_p3 = scmp.ne.s32.totalorder %s46_s24, %s930_s15  ;;  %p936_p5 = scmp.lt.s32.totalorder %s930_s15, %s930_s15 }
  0x10   :  { %p937_p6 = por %p936_p5, %p935_p4 }
  0x12   :  { %p938_p7 = pnand %p937_p6, %p931_p3 }
  0x14   :  { %941 = shalt.err (!%p938_p7)
}
  0x15   :  { %s1016_s16 = smov 64   ;;  %s1017_s17 = smov 4  }
  0x16   :  { %51 = dma.hbm_to_vmem [thread:$0]  %s1268_s4, 512, %s46_s24, [#allocation6], %s1016_s16, %s1016_s16, %s1017_s17  }
  0x17   :  { %s942_s22 = scalar_lea.hbm %s1264_s0, 128 }
  0x18   :  { %p943_p8 = scmp.ne.s32.totalorder %s1264_s0, %s942_s22  ;;  %p946_p9 = scmp.lt.u32.totalorder %s942_s22, %s1264_s0 }
  0x1a   :  { %p948_p10 = pnand %p946_p9, %p943_p8 }
  0x1c   :  { %951 = shalt.err (!%p948_p10)
}
  0x1d   :  { %s952_s29 = scalar_lea.vmem %s1098_s26, 128  ;;  %p957_p12 = scmp.lt.s32.totalorder %s1098_s26, %s1098_s26 }
  0x1e   :  { %p953_p11 = scmp.ne.s32.totalorder %s1098_s26, %s952_s29  ;;  %p958_p13 = scmp.lt.s32.totalorder %s952_s29, %s952_s29 }
  0x20   :  { %p959_p0 = por %p958_p13, %p957_p12 }
  0x22   :  { %p960_p1 = pnand %p959_p0, %p953_p11 }
  0x24   :  { %963 = shalt.err (!%p960_p1)
}
  0x25   :  { %33 = dma.hbm_to_vmem [thread:$0]  %s1264_s0, 128, %s1098_s26, [#allocation4], %s1016_s16, %s1016_s16, %s1017_s17  }
  0x26   :  { %s1018_s30 = smov [#allocation7]   ;;  %s1019_s11 = smov [#allocation8]  }
  0x27   :  { %s57_s13 = sshll.u32 %s1018_s30, 4  ;;  %s73_s14 = sshll.u32 %s1019_s11, 4  ;;  %s58_s13 = int_to_ptr.vmem [resolvable:$true] %s57_s13  ;;  %s1135_s14 = int_to_ptr.vmem [resolvable:$true] %s73_s14 }
  0x28   :  { %s964_s19 = scalar_lea.hbm %s1269_s5, 1024 }
  0x29   :  { %p965_p2 = scmp.ne.s32.totalorder %s1269_s5, %s964_s19  ;;  %p968_p3 = scmp.lt.u32.totalorder %s964_s19, %s1269_s5 }
  0x2b   :  { %p970_p4 = pnand %p968_p3, %p965_p2 }
  0x2d   :  { %973 = shalt.err (!%p970_p4)
}
  0x2e   :  { %s974_s0 = scalar_lea.vmem %s58_s13, 1024  ;;  %p979_p6 = scmp.lt.s32.totalorder %s58_s13, %s58_s13 }
  0x2f   :  { %p975_p5 = scmp.ne.s32.totalorder %s58_s13, %s974_s0  ;;  %p980_p7 = scmp.lt.s32.totalorder %s974_s0, %s974_s0 }
  0x31   :  { %p981_p8 = por %p980_p7, %p979_p6 }
  0x33   :  { %p982_p9 = pnand %p981_p8, %p975_p5 }
  0x35   :  { %985 = shalt.err (!%p982_p9)
}
  0x36   :  { %63 = dma.hbm_to_vmem [thread:$0]  %s1269_s5, 1024, %s58_s13, [#allocation6], %s1016_s16, %s1016_s16, %s1017_s17  }
  0x37   :  { %s986_s29 = scalar_lea.hbm %s1272_s8, 1024 }
  0x38   :  { %p987_p10 = scmp.ne.s32.totalorder %s1272_s8, %s986_s29  ;;  %p990_p11 = scmp.lt.u32.totalorder %s986_s29, %s1272_s8 }
  0x3a   :  { %p992_p12 = pnand %p990_p11, %p987_p10 }
  0x3c   :  { %995 = shalt.err (!%p992_p12)
}
  0x3d   :  { %s996_s15 = scalar_lea.vmem %s1135_s14, 1024  ;;  %p1001_p0 = scmp.lt.s32.totalorder %s1135_s14, %s1135_s14 }
  0x3e   :  { %p997_p13 = scmp.ne.s32.totalorder %s1135_s14, %s996_s15  ;;  %p1002_p1 = scmp.lt.s32.totalorder %s996_s15, %s996_s15 }
  0x40   :  { %p1003_p2 = por %p1002_p1, %p1001_p0 }
  0x42   :  { %p1004_p3 = pnand %p1003_p2, %p997_p13 }
  0x44   :  { %1007 = shalt.err (!%p1004_p3)
}
  0x45   :  { %79 = dma.hbm_to_vmem [thread:$0]  %s1272_s8, 1024, %s1135_s14, [#allocation9], %s1016_s16, %s1016_s16, %s1017_s17  }
  0x46   :  { %1008 = dma.done.wait [#allocation4], 128  }
  0x47   :  { %1009 = vsyncadd [#allocation4], 4294967168 }
  0x48   :  { %1010 = dma.done.wait [#allocation6], 1536  }
  0x49   :  { %1011 = vsyncadd [#allocation6], 4294965760 }
  0x4a   :  { %1012 = dma.done.wait [#allocation9], 1024  }
  0x4b   :  { %1013 = vsyncadd [#allocation9], 4294966272  ;;  %v1020_v1 = vmov 0.0   ;;  %vm1021_vm0 = vmmov 0   ;;  %v1022_v2 = vmov 2   ;;  %v1023_v3 = vmov 0  }
  0x4c   :  { %783 = vmatprep.subr.bf16.mxu0 %v1020_v1  ;;  %791 = vmatprep.mubr.msk.bf16.mxu0 %vm1021_vm0, %v1020_v1  ;;  %v882_v4 = vld [vmem:[%s1266_s2] sm:$0xff]   ;;  %v883_v5 = vld [vmem:[%s1266_s2 + $0x8] sm:$0xff]   ;;  %v884_v6 = vld [vmem:[%s1266_s2 + $0x10] sm:$0xff]   ;;  %vm145_vm1 = vcmask 523264   ;;  %v1024_v12 = vmov 1   ;;  %v1025_v14 = vmov 3   ;;  %v373_v34 = vlaneseq }
  0x4d   :  { %871 = vset.pattern.permute.xlu1 %v1022_v2  ;;  %869 = vset.pattern.permute.xlu0 %v1023_v3  ;;  %v372_v7 = vld [vmem:[%s1265_s1 + $0x8] sm:$0xff]  ;;  %v371_v8 = vld [vmem:[%s1265_s1] sm:$0xff]  ;;  %v885_v11 = vld [vmem:[%s1266_s2 + $0x18] sm:$0xff]   ;;  %v1026_v15 = vmov 4   ;;  %v1027_v16 = vmov 5   ;;  %v1028_v18 = vmov 6  }
  0x4e   :  { %795 = vmatprep.subr.bf16.mxu1 %v1020_v1  ;;  %811 = vmatprep.mubr.msk.bf16.mxu1 %vm1021_vm0, %v1020_v1  ;;  %v389_v9 = vadd.s32 8, %v371_v8  ;;  %v390_v10 = vadd.s32 8, %v372_v7  ;;  %v886_v13 = vld [vmem:[#allocation3] sm:$0xff]   ;;  %v887_v17 = vld [vmem:[#allocation5] sm:$0xff]   ;;  %v888_v19 = vld [vmem:[#allocation5 + $0x8] sm:$0xff]   ;;  %v1029_v20 = vmov 7  }
  0x4f   :  { %784 = vmatpush3.bf16.msra.mxu0 %v882_v4  ;;  %409 = vperm.xlu1 %871, %v372_v7   ;;  %v889_v21 = vld [vmem:[#allocation5 + $0x10] sm:$0xff]   ;;  %v890_v22 = vld [vmem:[#allocation5 + $0x18] sm:$0xff]   ;;  %v892_v24 = vld [vmem:[#allocation7] sm:$0xff]   ;;  %v374_v37 = vand.u32 127, %v373_v34 }
  0x50   :  { %785 = vmatprep.subr.bf16.mxu0 %v1020_v1  ;;  %376 = vperm.xlu0 %869, %v371_v8   ;;  %v891_v23 = vld [vmem:[%s1270_s6] sm:$0xff]   ;;  %v893_v25 = vld [vmem:[#allocation7 + $0x8] sm:$0xff]   ;;  %v896_v28 = vld [vmem:[#allocation7 + $0x20] sm:$0xff]  }
  0x51   :  { %796 = vmatpush3.bf16.msra.mxu1 %v892_v24  ;;  %v894_v26 = vld [vmem:[#allocation7 + $0x10] sm:$0xff]   ;;  %v895_v27 = vld [vmem:[#allocation7 + $0x18] sm:$0xff]   ;;  %v897_v29 = vld [vmem:[#allocation7 + $0x28] sm:$0xff]  }
  0x52   :  { %797 = vmatprep.subr.bf16.mxu1 %v1020_v1  ;;  %v898_v30 = vld [vmem:[#allocation7 + $0x30] sm:$0xff]   ;;  %v899_v31 = vld [vmem:[#allocation7 + $0x38] sm:$0xff]  }
  0x53   :  { %786 = vmatpush3.bf16.msra.mxu0 %v883_v5  ;;  %872 = vset.pattern.permute.xlu1 %v1024_v12  ;;  %v902_v34 = vld [vmem:[#allocation8 + $0x10] sm:$0xff]  }
  0x54   :  { %787 = vmatprep.subr.bf16.mxu0 %v1020_v1  ;;  %392 = vperm.xlu1 %872, %v389_v9  }
  0x55   :  { %379 = vperm.xlu0 %869, %v372_v7   ;;  %798 = vmatpush3.bf16.msra.mxu1 %v893_v25 }
  0x56   :  { %799 = vmatprep.subr.bf16.mxu1 %v1020_v1 }
  0x57   :  { %788 = vmatpush3.bf16.msra.mxu0 %v884_v6 }
  0x58   :  { %789 = vmatprep.subr.bf16.mxu0 %v1020_v1  ;;  %395 = vperm.xlu1 %872, %v390_v10  }
  0x59   :  { %870 = vset.pattern.permute.xlu0 %v1022_v2  ;;  %800 = vmatpush3.bf16.msra.mxu1 %v894_v26 }
  0x5a   :  { %406 = vperm.xlu0 %870, %v371_v8   ;;  %801 = vmatprep.subr.bf16.mxu1 %v1020_v1 }
  0x5b   :  { %790 = vmatpush3.bf16.msra.mxu0 %v885_v11 }
  0x5c   :  { %815 = vmatprep.subr.bf16.mxu0 %v1020_v1  ;;  %873 = vset.pattern.permute.xlu1 %v1025_v14 }
  0x5d   :  { %420 = vperm.xlu1 %873, %v389_v9   ;;  %802 = vmatpush3.bf16.msra.mxu1 %v895_v27 }
  0x5e   :  { %792 = vmatmul.mubr.msk.bf16.vlgmr.msra.gmra.mrb[0].mxu0 %vm145_vm1, %v886_v13  ;;  %874 = vset.pattern.permute.xlu0 %v1025_v14 }
  0x5f   :  { %823 = vmatprep.mubr.msk.bf16.mxu0 %vm1021_vm0, %v1020_v1  ;;  %423 = vperm.xlu0 %874, %v390_v10  }
  0x60   :  { %816 = vmatpush3.bf16.msra.mxu0 %v887_v17  ;;  %803 = vmatprep.subr.bf16.mxu1 %v1020_v1 }
  0x61   :  { %875 = vset.pattern.permute.xlu1 %v1026_v15  ;;  %817 = vmatprep.subr.bf16.mxu0 %v1020_v1 }
  0x62   :  { %434 = vperm.xlu1 %875, %v371_v8   ;;  %804 = vmatpush3.bf16.msra.mxu1 %v896_v28 }
  0x63   :  { %876 = vset.pattern.permute.xlu0 %v1027_v16  ;;  %805 = vmatprep.subr.bf16.mxu1 %v1020_v1 }
  0x64   :  { %448 = vperm.xlu0 %876, %v389_v9   ;;  %818 = vmatpush3.bf16.msra.mxu0 %v888_v19 }
  0x65   :  { %819 = vmatprep.subr.bf16.mxu0 %v1020_v1 }
  0x66   :  { %437 = vperm.xlu1 %875, %v372_v7   ;;  %806 = vmatpush3.bf16.msra.mxu1 %v897_v29 }
  0x67   :  { %807 = vmatprep.subr.bf16.mxu1 %v1020_v1 }
  0x68   :  { %879 = vset.pattern.permute.xlu0 %v1028_v18  ;;  %820 = vmatpush3.bf16.msra.mxu0 %v889_v21 }
  0x69   :  { %465 = vperm.xlu0 %879, %v372_v7   ;;  %821 = vmatprep.subr.bf16.mxu0 %v1020_v1 }
  0x6a   :  { %877 = vset.pattern.permute.xlu1 %v1027_v16  ;;  %808 = vmatpush3.bf16.msra.mxu1 %v898_v30 }
  0x6b   :  { %451 = vperm.xlu1 %877, %v390_v10   ;;  %809 = vmatprep.subr.bf16.mxu1 %v1020_v1 }
  0x6c   :  { %822 = vmatpush3.bf16.msra.mxu0 %v890_v22 }
  0x6d   :  { %881 = vset.pattern.permute.xlu0 %v1029_v20  ;;  %827 = vmatprep.subr.bf16.mxu0 %v1020_v1 }
  0x6e   :  { %810 = vmatpush3.bf16.msra.mxu1 %v899_v31 }
  0x6f   :  { %878 = vset.pattern.permute.xlu1 %v1028_v18  ;;  %824 = vmatmul.mubr.msk.bf16.vlgmr.msra.gmra.mrb[4].mxu0 %vm145_vm1, %v886_v13  ;;  %v703_v18 = vld [vmem:[%s1267_s3] ss:$0 sm:$0xff] }
  0x70   :  { %462 = vperm.xlu1 %878, %v371_v8   ;;  %829 = vmatprep.mubr.msk.bf16.mxu0 %vm1021_vm0, %v1020_v1 }
  0x71   :  { %828 = vmatpush3.bf16.msra.mxu0 %v891_v23  ;;  %833 = vmatprep.subr.bf16.mxu1 %v1020_v1 }
  0x74   :  { %880 = vset.pattern.permute.xlu1 %v1029_v20 }
  0x75   :  { %476 = vperm.xlu1 %880, %v389_v9  }
  0x79   :  { %479 = vperm.xlu1 %880, %v390_v10  }
  0xce   :  { %v410_v32 = vpop.permute.xlu1 %409 }
  0xcf   :  { %v377_v33 = vpop.permute.xlu0 %376  ;;  %vm412_vm7 = vcmp.eq.s32.totalorder %v374_v37, %v410_v32  ;;  %v900_v32 = vld [vmem:[#allocation8] sm:$0xff]  }
  0xd0   :  { %vm381_vm3 = vcmp.eq.s32.totalorder %v374_v37, %v377_v33  ;;  %v728_v50 = vsel %vm412_vm7, 1.0, %v1020_v1  ;;  %v901_v33 = vld [vmem:[#allocation8 + $0x8] sm:$0xff]  }
  0xd1   :  { %v723_v42 = vsel %vm381_vm3, 1.0, %v1020_v1  ;;  %vm498_vm3 = vcmask 130048  }
  0xd3   :  { %v393_v35 = vpop.permute.xlu1 %392 }
  0xd4   :  { %v380_v36 = vpop.permute.xlu0 %379  ;;  %vm397_vm2 = vcmp.eq.s32.totalorder %v374_v37, %v393_v35  ;;  %v903_v35 = vld [vmem:[#allocation8 + $0x18] sm:$0xff]  }
  0xd5   :  { %vm382_vm5 = vcmp.eq.s32.totalorder %v374_v37, %v380_v36  ;;  %v725_v41 = vsel %vm397_vm2, 1.0, %v1020_v1  ;;  %v904_v36 = vld [vmem:[#allocation8 + $0x20] sm:$0xff]  }
  0xd6   :  { %v724_v44 = vsel %vm382_vm5, 1.0, %v1020_v1  ;;  %v403_v45 = vadd.f32 %v725_v41, %v723_v42 }
  0xd7   :  { %v396_v38 = vpop.permute.xlu1 %395 }
  0xd8   :  { %vm398_vm4 = vcmp.eq.s32.totalorder %v374_v37, %v396_v38  ;;  %v906_v38 = vld [vmem:[#allocation8 + $0x30] sm:$0xff]  }
  0xd9   :  { %v407_v40 = vpop.permute.xlu0 %406  ;;  %v726_v43 = vsel %vm398_vm4, 1.0, %v1020_v1 }
  0xda   :  { %vm411_vm6 = vcmp.eq.s32.totalorder %v374_v37, %v407_v40  ;;  %v404_v49 = vadd.f32 %v726_v43, %v724_v44 }
  0xdb   :  { %v727_v47 = vsel %vm411_vm6, 1.0, %v1020_v1 }
  0xdc   :  { %v421_v39 = vpop.permute.xlu1 %420  ;;  %v417_v52 = vadd.f32 %v727_v47, %v403_v45  ;;  %v418_v54 = vadd.f32 %v728_v50, %v404_v49  ;;  %v741_v47 = vld [vmem:[%s1271_s7] ss:$0 sm:$0xff] }
  0xdd   :  { %vm425_vm8 = vcmp.eq.s32.totalorder %v374_v37, %v421_v39  ;;  %v907_v39 = vld [vmem:[#allocation8 + $0x38] sm:$0xff]  }
  0xde   :  { %v424_v48 = vpop.permute.xlu0 %423  ;;  %v729_v53 = vsel %vm425_vm8, 1.0, %v1020_v1 }
  0xdf   :  { %vm426_vm9 = vcmp.eq.s32.totalorder %v374_v37, %v424_v48  ;;  %v431_v57 = vadd.f32 %v729_v53, %v417_v52 }
  0xe0   :  { %v730_v55 = vsel %vm426_vm9, 1.0, %v1020_v1 }
  0xe1   :  { %v435_v46 = vpop.permute.xlu1 %434  ;;  %v432_v60 = vadd.f32 %v730_v55, %v418_v54 }
  0xe2   :  { %vm439_vm10 = vcmp.eq.s32.totalorder %v374_v37, %v435_v46 }
  0xe3   :  { %v449_v56 = vpop.permute.xlu0 %448  ;;  %v731_v58 = vsel %vm439_vm10, 1.0, %v1020_v1 }
  0xe4   :  { %vm453_vm12 = vcmp.eq.s32.totalorder %v374_v37, %v449_v56  ;;  %v445_v62 = vadd.f32 %v731_v58, %v431_v57  ;;  %v742_v57 = vld [vmem:[%s1273_s9] ss:$0 sm:$0xff] }
  0xe5   :  { %v438_v51 = vpop.permute.xlu1 %437  ;;  %v733_v63 = vsel %vm453_vm12, 1.0, %v1020_v1 }
  0xe6   :  { %vm440_vm11 = vcmp.eq.s32.totalorder %v374_v37, %v438_v51  ;;  %v459_v5 = vadd.f32 %v733_v63, %v445_v62 }
  0xe7   :  { %v732_v61 = vsel %vm440_vm11, 1.0, %v1020_v1 }
  0xe8   :  { %v466_v0 = vpop.permute.xlu0 %465  ;;  %v446_v2 = vadd.f32 %v732_v61, %v432_v60 }
  0xe9   :  { %vm468_vm15 = vcmp.eq.s32.totalorder %v374_v37, %v466_v0  ;;  %v751_v0 = vld [vmem:[%s1274_s10] ss:$0 sm:$0xff] }
  0xea   :  { %v452_v59 = vpop.permute.xlu1 %451  ;;  %v736_v9 = vsel %vm468_vm15, 1.0, %v1020_v1 }
  0xeb   :  { %vm454_vm13 = vcmp.eq.s32.totalorder %v374_v37, %v452_v59 }
  0xec   :  { %v734_v4 = vsel %vm454_vm13, 1.0, %v1020_v1 }
  0xed   :  { %v460_v7 = vadd.f32 %v734_v4, %v446_v2 }
  0xef   :  { %v463_v3 = vpop.permute.xlu1 %462  ;;  %v474_v12 = vadd.f32 %v736_v9, %v460_v7 }
  0xf0   :  { %vm467_vm14 = vcmp.eq.s32.totalorder %v374_v37, %v463_v3 }
  0xf1   :  { %v735_v6 = vsel %vm467_vm14, 1.0, %v1020_v1 }
  0xf2   :  { %v473_v10 = vadd.f32 %v735_v6, %v459_v5  ;;  %v752_v6 = vld [vmem:[#allocation2] ss:$0 sm:$0xff] }
  0xf4   :  { %v477_v8 = vpop.permute.xlu1 %476 }
  0xf5   :  { %vm481_vm1 = vcmp.eq.s32.totalorder %v374_v37, %v477_v8 }
  0xf6   :  { %v737_v11 = vsel %vm481_vm1, 1.0, %v1020_v1 }
  0xf7   :  { %v487_v14 = vadd.f32 %v737_v11, %v473_v10 }
  0xf8   :  { %v480_v13 = vpop.permute.xlu1 %479 }
  0xf9   :  { %vm482_vm2 = vcmp.eq.s32.totalorder %v374_v37, %v480_v13  ;;  %v905_v37 = vld [vmem:[#allocation8 + $0x28] sm:$0xff]  }
  0xfa   :  { %v738_v15 = vsel %vm482_vm2, 1.0, %v1020_v1 }
  0xfb   :  { %v488_v16 = vadd.f32 %v738_v15, %v474_v12 }
  0xfd   :  { %v489_v17 = vpack.c.bf16 %v488_v16, %v487_v14 }
  0xff   :  { %830 = vmatmul.mubr.msk.bf16.vlgmr.msra.gmra.mrb[8].mxu0 %vm498_vm3, %v489_v17 }
 0x131   :  { %v183_v19 = vpop.f32.mrb[0].mxu0 }
 0x132   :  { %v184_v20 = vadd.f32 %v703_v18, %v183_v19  ;;  %v793_v21 = vpop.f32.mrb[1].mxu0 }
 0x133   :  { %v186_v22 = vpop.f32.mrb[2].mxu0 }
 0x134   :  { %v187_v23 = vadd.f32 %v703_v18, %v186_v22  ;;  %v794_v24 = vpop.f32.mrb[3].mxu0  ;;  %908 = vtanh.f32 %v184_v20 }
 0x136   :  { %910 = vtanh.f32 %v187_v23 }
 0x13e   :  { %v909_v25 = vpop.eup %908 }
 0x140   :  { %v911_v26 = vpop.eup %910 }
 0x141   :  { %v200_v27 = vpack.c.bf16 %v911_v26, %v909_v25 }
 0x142   :  { %v364_v28 = vpop.f32.mrb[4].mxu0 }
 0x143   :  { %812 = vmatmul.mubr.bf16.vlgmr.msra.gmra.mrb[0].mxu1 %v200_v27  ;;  %v825_v29 = vpop.f32.mrb[5].mxu0 }
 0x144   :  { %849 = vmatprep.mubr.msk.bf16.mxu1 %vm1021_vm0, %v1020_v1  ;;  %v367_v30 = vpop.f32.mrb[6].mxu0  ;;  %834 = vmatpush3.bf16.msra.mxu1 %v900_v32  ;;  %vm693_vm0 = vcmask 7168  }
 0x145   :  { %v826_v31 = vpop.f32.mrb[7].mxu0  ;;  %835 = vmatprep.subr.bf16.mxu1 %v1020_v1 }
 0x148   :  { %836 = vmatpush3.bf16.msra.mxu1 %v901_v33 }
 0x149   :  { %837 = vmatprep.subr.bf16.mxu1 %v1020_v1 }
 0x14c   :  { %838 = vmatpush3.bf16.msra.mxu1 %v902_v34 }
 0x14d   :  { %839 = vmatprep.subr.bf16.mxu1 %v1020_v1 }
 0x150   :  { %840 = vmatpush3.bf16.msra.mxu1 %v903_v35 }
 0x151   :  { %841 = vmatprep.subr.bf16.mxu1 %v1020_v1 }
 0x154   :  { %842 = vmatpush3.bf16.msra.mxu1 %v904_v36 }
 0x155   :  { %843 = vmatprep.subr.bf16.mxu1 %v1020_v1 }
 0x158   :  { %844 = vmatpush3.bf16.msra.mxu1 %v905_v37 }
 0x159   :  { %845 = vmatprep.subr.bf16.mxu1 %v1020_v1 }
 0x15c   :  { %846 = vmatpush3.bf16.msra.mxu1 %v906_v38 }
 0x15d   :  { %847 = vmatprep.subr.bf16.mxu1 %v1020_v1 }
 0x160   :  { %848 = vmatpush3.bf16.msra.mxu1 %v907_v39 }
 0x1d2   :  { %v536_v40 = vpop.f32.mrb[8].mxu0 }
 0x1d3   :  { %v831_v41 = vpop.f32.mrb[9].mxu0 }
 0x1d4   :  { %v539_v42 = vpop.f32.mrb[10].mxu0 }
 0x1d5   :  { %v832_v43 = vpop.f32.mrb[11].mxu0 }
 0x216   :  { %v299_v44 = vpop.f32.mrb[0].mxu1 }
 0x217   :  { %v365_v45 = vadd.f32 %v364_v28, %v299_v44  ;;  %v813_v46 = vpop.f32.mrb[1].mxu1 }
 0x218   :  { %v302_v48 = vpop.f32.mrb[2].mxu1 }
 0x219   :  { %v543_v49 = vadd.f32 %v536_v40, %v365_v45  ;;  %v368_v50 = vadd.f32 %v367_v30, %v302_v48  ;;  %v814_v51 = vpop.f32.mrb[3].mxu1 }
 0x21b   :  { %v552_v52 = vadd.f32 %v741_v47, %v543_v49  ;;  %v544_v53 = vadd.f32 %v539_v42, %v368_v50 }
 0x21d   :  { %v553_v54 = vadd.f32 %v741_v47, %v544_v53  ;;  %912 = vtanh.f32 %v552_v52 }
 0x21f   :  { %914 = vtanh.f32 %v553_v54 }
 0x227   :  { %v913_v1 = vpop.eup %912 }
 0x229   :  { %v915_v55 = vpop.eup %914 }
 0x22a   :  { %v556_v56 = vpack.c.bf16 %v915_v55, %v913_v1 }
 0x22c   :  { %850 = vmatmul.mubr.bf16.vlgmr.msra.gmra.mrb[4].mxu1 %v556_v56 }
 0x2ff   :  { %v662_v58 = vpop.f32.mrb[4].mxu1 }
 0x300   :  { %v663_v59 = vadd.f32 %v742_v57, %v662_v58  ;;  %v851_v60 = vpop.f32.mrb[5].mxu1 }
 0x301   :  { %v665_v61 = vpop.f32.mrb[6].mxu1 }
 0x302   :  { %916 = vtanh.f32 %v663_v59  ;;  %v666_v62 = vadd.f32 %v742_v57, %v665_v61  ;;  %v852_v63 = vpop.f32.mrb[7].mxu1 }
 0x304   :  { %918 = vtanh.f32 %v666_v62 }
 0x30c   :  { %v917_v2 = vpop.eup %916 }
 0x30d   :  { %v678_v3 = vmul.f32 %v917_v2, %v751_v0 }
 0x30e   :  { %v919_v4 = vpop.eup %918 }
 0x30f   :  { %680 = vadd.xlane.f32.xlu0 %v678_v3  ;;  %v679_v5 = vmul.f32 %v919_v4, %v751_v0 }
 0x311   :  { %682 = vadd.xlane.f32.xlu1 %v679_v5 }
 0x39c   :  { %v681_v7 = vpop.xlane.xlu0 %680 }
 0x39d   :  { %v691_v8 = vadd.f32 %v752_v6, %v681_v7 }
 0x39e   :  { %v683_v9 = vpop.xlane.xlu1 %682 }
 0x39f   :  { %694 = vst.msk [vmem:[%s1276_s12] sm:$0xff] %vm693_vm0, %v691_v8  ;;  %v692_v10 = vadd.f32 %v752_v6, %v683_v9 }
 0x3a1   :  { %695 = vst.msk [vmem:[%s1276_s12 + $0x8] sm:$0xff] %vm693_vm0, %v692_v10 }
 0x3a2   :  { %700 = vsyncpa [#allocation4], 1 }
 0x3a3   :  { %701 = vsyncpa [#allocation6], 1 }
 0x3a4   :  { %702 = vsyncpa [#allocation9], 1 }

</bundles_post_ra>
